<compile_context>
chip_gen: v7x
topology: tpu7x:2x2x1
jax: 0.10.0
libtpu: 0.0.40
codegen_flags: <defaults>
</compile_context>

<pallas_src>
import functools

import jax
import jax.numpy as jnp
from jax import lax
from jax.experimental import pallas as pl
from jax.experimental.pallas import tpu as pltpu

# LSNNParameters defaults (norse)
DT = 1e-3
TAU_SYN_INV = 1.0 / 5e-3      # 200.0
TAU_MEM_INV = 1.0 / 1e-2      # 100.0
TAU_ADAPT_INV = 1.0 / 700.0
V_LEAK = 0.0
V_TH = 1.0
V_RESET = 0.0
BETA = 1.8

_LANE = 128
_SUBLANE = 8


def _round_up(x, m):
    return (x + m - 1) // m * m


def _pick_time_block(T, max_tt=16):
    """Largest divisor of T that is <= max_tt (timesteps per grid step)."""
    for tt in range(min(T, max_tt), 0, -1):
        if T % tt == 0:
            return tt
    return 1


def _pick_batch_block(Bp, max_tb=256):
    """Largest multiple of 8 that divides Bp and is <= max_tb."""
    start = min(Bp, _round_up(max_tb, _SUBLANE) if max_tb >= _SUBLANE else _SUBLANE)
    start = start - (start % _SUBLANE)
    for tb in range(start, 0, -_SUBLANE):
        if Bp % tb == 0:
            return tb
    return Bp


def _choose_blocks(T, Bp, Hp, budget_bytes=24 * 1024 * 1024):
    """Pick (TT, TB) so the double-buffered working set stays under budget."""
    TT = _pick_time_block(T)
    TB = _pick_batch_block(Bp)

    def vmem_bytes(tt, tb):
        xw_blk = tt * tb * Hp * 4          # f32 input block
        out_blk = tt * tb * Hp * 4         # f32 spike block
        w_blk = Hp * Hp * 2                # bf16 resident weights
        state = 4 * tb * Hp * 4            # f32 carried state
        return 2 * (xw_blk + out_blk + w_blk + state)

    while vmem_bytes(TT, TB) > budget_bytes and TT > 1:
        TT = _pick_time_block(T, max_tt=TT - 1)
    while vmem_bytes(TT, TB) > budget_bytes and TB > _SUBLANE:
        TB = _pick_batch_block(Bp, max_tb=TB - _SUBLANE)
    return TT, TB


def _lsnn_kernel(tt_steps, xw_ref, w_rec_t_ref,
                 out_ref, zf_ref, vf_ref, if_ref, bf_ref):
    """grid = (batch_blocks, time_blocks); the time axis is the recurrence.

    xw_ref:      (TT, TB, Hp) f32  -- pre-projected input x[t] @ W_in.T
    w_rec_t_ref: (Hp, Hp)     bf16 -- W_rec.T, VMEM resident (constant index)
    out_ref:     (TT, TB, Hp) f32  -- per-timestep spikes
    zf/vf/if/bf: (TB, Hp)     f32  -- final state; constant block index along
                                      the time axis -> VMEM-resident carry.
    """
    t_blk = pl.program_id(1)

    # Zero initial state (LSNNCell.initial_state) at the first time block of
    # each batch block. The state lives in the final-state output refs.
    @pl.when(t_blk == 0)
    def _():
        zf_ref[...] = jnp.zeros_like(zf_ref)
        vf_ref[...] = jnp.zeros_like(vf_ref)
        if_ref[...] = jnp.zeros_like(if_ref)
        bf_ref[...] = jnp.zeros_like(bf_ref)

    w_rec_t = w_rec_t_ref[...]  # load once per grid step (bf16, resident)

    def step(tt, carry):
        z, v, i, b = carry
        # Voltage / current / adaptation decay.
        v_decayed = v + DT * TAU_MEM_INV * ((V_LEAK - v) + i)
        i_decayed = i + (-DT * TAU_SYN_INV) * i
        b_decayed = b + DT * TAU_ADAPT_INV * (V_TH - b)
        # Spike (heaviside forward of the "super" surrogate).
        z_new = (v_decayed - b_decayed > 0.0).astype(jnp.float32)
        # Reset.
        v_new = (1.0 - z_new) * v_decayed + z_new * V_RESET
        # Current jump: hoisted input projection + recurrent projection.
        # z is exactly 0/1 -> bf16 cast is lossless; f32 accumulation on MXU.
        i_new = (i_decayed + xw_ref[tt]
                 + jnp.dot(z.astype(jnp.bfloat16), w_rec_t,
                           preferred_element_type=jnp.float32))
        # Threshold adaptation (uses the NEW spike, per lsnn_step).
        b_new = b_decayed + z_new * (TAU_ADAPT_INV * BETA)
        # Per-timestep spike output (lane-dense, 128-aligned last dim).
        out_ref[tt] = z_new
        return z_new, v_new, i_new, b_new

    carry0 = (zf_ref[...], vf_ref[...], if_ref[...], bf_ref[...])
    z, v, i, b = lax.fori_loop(0, tt_steps, step, carry0, unroll=True)

    # Single state writeback per grid step (carried to the next time block).
    zf_ref[...] = z
    vf_ref[...] = v
    if_ref[...] = i
    bf_ref[...] = b


@jax.jit
def lsnn_layer_forward(x, w_in, w_rec):
    """x: [T, B, IN] f32; w_in: [H, IN]; w_rec: [H, H].

    Returns (outputs [T, B, H], (z, v, i, b) each [B, H])."""
    T, B, IN = x.shape
    H = w_in.shape[0]

    # 1) Hoist the input projection out of the recurrence: one big GEMM over
    #    all T*B rows (no sequential dependency).
    xw = jnp.einsum("tbi,hi->tbh", x, w_in)                      # (T, B, H) f32

    # 2) Pad batch to a sublane multiple and hidden to a lane multiple.
    #    Zero padding is inert: padded hidden units never cross threshold
    #    (v=0, i=0, b_decayed>0) and their recurrent weight rows are zero, so
    #    they never feed real units.
    Bp = _round_up(B, _SUBLANE)
    Hp = _round_up(H, _LANE)
    xw_p = jnp.pad(xw, ((0, 0), (0, Bp - B), (0, Hp - H)))
    w_rec_t = jnp.pad(w_rec.T, ((0, Hp - H), (0, Hp - H))).astype(jnp.bfloat16)

    # 3) Block TT timesteps per grid step; batch blocks form a parallel axis.
    TT, TB = _choose_blocks(T, Bp, Hp)
    grid = (Bp // TB, T // TT)

    out_shapes = (
        jax.ShapeDtypeStruct((T, Bp, Hp), jnp.float32),   # spikes per timestep
        jax.ShapeDtypeStruct((Bp, Hp), jnp.float32),      # final z
        jax.ShapeDtypeStruct((Bp, Hp), jnp.float32),      # final v
        jax.ShapeDtypeStruct((Bp, Hp), jnp.float32),      # final i
        jax.ShapeDtypeStruct((Bp, Hp), jnp.float32),      # final b
    )

    state_spec = pl.BlockSpec((TB, Hp), lambda b, t: (b, 0))
    grid_spec = pltpu.PrefetchScalarGridSpec(
        num_scalar_prefetch=0,
        grid=grid,
        in_specs=[
            pl.BlockSpec((TT, TB, Hp), lambda b, t: (t, b, 0)),   # xw[t-block]
            pl.BlockSpec((Hp, Hp), lambda b, t: (0, 0)),          # W_rec.T
        ],
        out_specs=[
            pl.BlockSpec((TT, TB, Hp), lambda b, t: (t, b, 0)),   # spikes
            state_spec, state_spec, state_spec, state_spec,       # final state
        ],
    )

    outs_p, zf, vf, i_f, bf = pl.pallas_call(
        functools.partial(_lsnn_kernel, TT),
        out_shape=out_shapes,
        grid_spec=grid_spec,
        compiler_params=pltpu.CompilerParams(
            # Batch blocks are independent (megacore-shardable); time is a
            # true recurrence and must stay sequential.
            dimension_semantics=("parallel", "arbitrary"),
            vmem_limit_bytes=32 * 1024 * 1024,
        ),
    )(xw_p, w_rec_t)

    outs = outs_p[:, :B, :H]
    state = (zf[:B, :H], vf[:B, :H], i_f[:B, :H], bf[:B, :H])
    return outs, state


def _lsnn_reference(x, w_in, w_rec):
    """Pure-JAX reference (mirrors norse lsnn_step) for verification.

    The kernel performs the recurrent matmul with bf16 weights (f32
    accumulation; lossless for the 0/1 spike operand); mirror that weight
    rounding here so the numerical comparison is apples-to-apples."""
    B = x.shape[1]
    H = w_in.shape[0]
    w_rec_r = w_rec.astype(jnp.bfloat16).astype(jnp.float32)
    z0 = jnp.zeros((B, H), jnp.float32)
    state0 = (z0, z0, z0, z0)

    def step(state, x_t):
        z, v, i, b = state
        v_decayed = v + DT * TAU_MEM_INV * ((V_LEAK - v) + i)
        i_decayed = i + (-DT * TAU_SYN_INV) * i
        b_decayed = b + DT * TAU_ADAPT_INV * (V_TH - b)
        z_new = (v_decayed - b_decayed > 0.0).astype(jnp.float32)
        v_new = (1.0 - z_new) * v_decayed + z_new * V_RESET
        i_new = i_decayed + x_t @ w_in.T + z @ w_rec_r.T
        b_new = b_decayed + z_new * (TAU_ADAPT_INV * BETA)
        return (z_new, v_new, i_new, b_new), z_new

    state, outs = jax.lax.scan(step, state0, x)
    return outs, state


if __name__ == "__main__":
    # Small shapes consistent with the module: seq=8, batch=2, in=4, hidden=32.
    T, B, IN, H = 8, 2, 4, 32

    key = jax.random.PRNGKey(0)
    k_x, k_win, k_wrec = jax.random.split(key, 3)

    # Deterministic "randn * sqrt(2/hidden)" init, matching LSNNCell.__init__.
    w_in = jax.random.normal(k_win, (H, IN), jnp.float32) * jnp.sqrt(2.0 / H)
    w_rec = jax.random.normal(k_wrec, (H, H), jnp.float32) * jnp.sqrt(2.0 / H)
    # Scale input so some neurons actually cross threshold within 8 steps.
    x = jax.random.normal(k_x, (T, B, IN), jnp.float32) * 3.0

    outs, (zf, vf, i_f, bf) = lsnn_layer_forward(x, w_in, w_rec)
    jax.block_until_ready((outs, zf, vf, i_f, bf))

    # Verify against the pure-JAX reference.
    ref_outs, (rz, rv, ri, rb) = _lsnn_reference(x, w_in, w_rec)
    assert outs.shape == (T, B, H)
    assert jnp.allclose(outs, ref_outs, atol=1e-4), "spike outputs mismatch"
    assert jnp.allclose(zf, rz, atol=1e-4)
    assert jnp.allclose(vf, rv, atol=1e-4)
    assert jnp.allclose(i_f, ri, atol=1e-4)
    assert jnp.allclose(bf, rb, atol=1e-4)

    print("KERNEL_OK")
</pallas_src>

<mosaic_0001>
module attributes {stable_mosaic.version = 11 : i64} {
  func.func @_lsnn_kernel(%arg0: i32, %arg1: i32, %arg2: memref<8x8x128xf32, #tpu.memory_space<vmem>>, %arg3: memref<128x128xbf16, #tpu.memory_space<vmem>>, %arg4: memref<8x8x128xf32, #tpu.memory_space<vmem>>, %arg5: memref<8x128xf32, #tpu.memory_space<vmem>>, %arg6: memref<8x128xf32, #tpu.memory_space<vmem>>, %arg7: memref<8x128xf32, #tpu.memory_space<vmem>>, %arg8: memref<8x128xf32, #tpu.memory_space<vmem>>) attributes {dimension_semantics = [#tpu.dimension_semantics<parallel>, #tpu.dimension_semantics<arbitrary>], iteration_bounds = array<i64: 1, 1>, scalar_prefetch = 0 : i64, scratch_operands = 0 : i64, tpu.core_type = #tpu.core_type<tc>, window_params = [{transform_indices = @transform_0, window_bounds = array<i64: 8, 8, 128>}, {pipeline_mode = #tpu.pipeline_mode<synchronous>, transform_indices = @transform_1, window_bounds = array<i64: 128, 128>}, {transform_indices = @transform_2, window_bounds = array<i64: 8, 8, 128>}, {transform_indices = @transform_3, window_bounds = array<i64: 8, 128>}, {transform_indices = @transform_4, window_bounds = array<i64: 8, 128>}, {transform_indices = @transform_5, window_bounds = array<i64: 8, 128>}, {transform_indices = @transform_6, window_bounds = array<i64: 8, 128>}]} {
    %c0_i32 = arith.constant 0 : i32
    %0 = arith.cmpi eq, %arg1, %c0_i32 : i32
    %1 = arith.extui %0 : i1 to i32
    %c0_i32_0 = arith.constant 0 : i32
    %2 = arith.cmpi ne, %1, %c0_i32_0 : i32
    scf.if %2 {
      %cst_130 = arith.constant 0.000000e+00 : f32
      %324 = vector.broadcast %cst_130 : f32 to vector<8x128xf32>
      %c0_131 = arith.constant 0 : index
      %c0_132 = arith.constant 0 : index
      %325 = vector.load %arg5[%c0_131, %c0_132] : memref<8x128xf32, #tpu.memory_space<vmem>>, vector<8x128xf32>
      tpu.vector_store %arg5[%c0_131, %c0_132], %324 {strides = array<i32>} : memref<8x128xf32, #tpu.memory_space<vmem>>, vector<8x128xf32>,
      %cst_133 = arith.constant 0.000000e+00 : f32
      %326 = vector.broadcast %cst_133 : f32 to vector<8x128xf32>
      %c0_134 = arith.constant 0 : index
      %c0_135 = arith.constant 0 : index
      %327 = vector.load %arg6[%c0_134, %c0_135] : memref<8x128xf32, #tpu.memory_space<vmem>>, vector<8x128xf32>
      tpu.vector_store %arg6[%c0_134, %c0_135], %326 {strides = array<i32>} : memref<8x128xf32, #tpu.memory_space<vmem>>, vector<8x128xf32>,
      %cst_136 = arith.constant 0.000000e+00 : f32
      %328 = vector.broadcast %cst_136 : f32 to vector<8x128xf32>
      %c0_137 = arith.constant 0 : index
      %c0_138 = arith.constant 0 : index
      %329 = vector.load %arg7[%c0_137, %c0_138] : memref<8x128xf32, #tpu.memory_space<vmem>>, vector<8x128xf32>
      tpu.vector_store %arg7[%c0_137, %c0_138], %328 {strides = array<i32>} : memref<8x128xf32, #tpu.memory_space<vmem>>, vector<8x128xf32>,
      %cst_139 = arith.constant 0.000000e+00 : f32
      %330 = vector.broadcast %cst_139 : f32 to vector<8x128xf32>
      %c0_140 = arith.constant 0 : index
      %c0_141 = arith.constant 0 : index
      %331 = vector.load %arg8[%c0_140, %c0_141] : memref<8x128xf32, #tpu.memory_space<vmem>>, vector<8x128xf32>
      tpu.vector_store %arg8[%c0_140, %c0_141], %330 {strides = array<i32>} : memref<8x128xf32, #tpu.memory_space<vmem>>, vector<8x128xf32>,
    } else {
    }
    %c0 = arith.constant 0 : index
    %c0_1 = arith.constant 0 : index
    %3 = vector.load %arg3[%c0, %c0_1] : memref<128x128xbf16, #tpu.memory_space<vmem>>, vector<128x128xbf16>
    %c0_2 = arith.constant 0 : index
    %c0_3 = arith.constant 0 : index
    %4 = vector.load %arg5[%c0_2, %c0_3] : memref<8x128xf32, #tpu.memory_space<vmem>>, vector<8x128xf32>
    %c0_4 = arith.constant 0 : index
    %c0_5 = arith.constant 0 : index
    %5 = vector.load %arg6[%c0_4, %c0_5] : memref<8x128xf32, #tpu.memory_space<vmem>>, vector<8x128xf32>
    %c0_6 = arith.constant 0 : index
    %c0_7 = arith.constant 0 : index
    %6 = vector.load %arg7[%c0_6, %c0_7] : memref<8x128xf32, #tpu.memory_space<vmem>>, vector<8x128xf32>
    %c0_8 = arith.constant 0 : index
    %c0_9 = arith.constant 0 : index
    %7 = vector.load %arg8[%c0_8, %c0_9] : memref<8x128xf32, #tpu.memory_space<vmem>>, vector<8x128xf32>
    %c0_i32_10 = arith.constant 0 : i32
    %cst = arith.constant 0.000000e+00 : f32
    %8 = vector.broadcast %cst : f32 to vector<8x128xf32>
    %9 = arith.subf %8, %5 : vector<8x128xf32>
    %10 = arith.addf %9, %6 : vector<8x128xf32>
    %cst_11 = arith.constant 1.000000e-01 : f32
    %11 = vector.broadcast %cst_11 : f32 to vector<8x128xf32>
    %12 = arith.mulf %11, %10 : vector<8x128xf32>
    %13 = arith.addf %5, %12 : vector<8x128xf32>
    %cst_12 = arith.constant -2.000000e-01 : f32
    %14 = vector.broadcast %cst_12 : f32 to vector<8x128xf32>
    %15 = arith.mulf %14, %6 : vector<8x128xf32>
    %16 = arith.addf %6, %15 : vector<8x128xf32>
    %cst_13 = arith.constant 1.000000e+00 : f32
    %17 = vector.broadcast %cst_13 : f32 to vector<8x128xf32>
    %18 = arith.subf %17, %7 : vector<8x128xf32>
    %cst_14 = arith.constant 1.42857141E-6 : f32
    %19 = vector.broadcast %cst_14 : f32 to vector<8x128xf32>
    %20 = arith.mulf %19, %18 : vector<8x128xf32>
    %21 = arith.addf %7, %20 : vector<8x128xf32>
    %22 = arith.subf %13, %21 : vector<8x128xf32>
    %cst_15 = arith.constant 0.000000e+00 : f32
    %23 = vector.broadcast %cst_15 : f32 to vector<8x128xf32>
    %24 = arith.cmpf ogt, %22, %23 : vector<8x128xf32>
    %25 = arith.extui %24 : vector<8x128xi1> to vector<8x128xi32>
    %26 = arith.sitofp %25 : vector<8x128xi32> to vector<8x128xf32>
    %cst_16 = arith.constant 1.000000e+00 : f32
    %27 = vector.broadcast %cst_16 : f32 to vector<8x128xf32>
    %28 = arith.subf %27, %26 : vector<8x128xf32>
    %29 = arith.mulf %28, %13 : vector<8x128xf32>
    %cst_17 = arith.constant 0.000000e+00 : f32
    %30 = vector.broadcast %cst_17 : f32 to vector<8x128xf32>
    %31 = arith.mulf %26, %30 : vector<8x128xf32>
    %32 = arith.addf %29, %31 : vector<8x128xf32>
    %33 = arith.index_cast %c0_i32_10 : i32 to index
    %c0_18 = arith.constant 0 : index
    %c0_19 = arith.constant 0 : index
    %34 = vector.load %arg2[%33, %c0_18, %c0_19] : memref<8x8x128xf32, #tpu.memory_space<vmem>>, vector<1x8x128xf32>
    %35 = vector.shape_cast %34 : vector<1x8x128xf32> to vector<8x128xf32>
    %36 = arith.addf %16, %35 : vector<8x128xf32>
    %37 = arith.truncf %4 : vector<8x128xf32> to vector<8x128xbf16>
    %cst_20 = arith.constant dense<0.000000e+00> : vector<8x128xf32>
    %38 = tpu.matmul %37, %3, %cst_20 {dimension_numbers = #tpu.dot_dimension_numbers<[1], [0], [0], [1], [0, 0, 1, 1], [], []>} : vector<8x128xbf16>, vector<128x128xbf16>, vector<8x128xf32> -> vector<8x128xf32>
    %39 = arith.addf %36, %38 : vector<8x128xf32>
    %cst_21 = arith.constant 0.00257142866 : f32
    %40 = vector.broadcast %cst_21 : f32 to vector<8x128xf32>
    %41 = arith.mulf %26, %40 : vector<8x128xf32>
    %42 = arith.addf %21, %41 : vector<8x128xf32>
    %43 = arith.index_cast %c0_i32_10 : i32 to index
    %c0_22 = arith.constant 0 : index
    %c0_23 = arith.constant 0 : index
    %44 = vector.load %arg4[%43, %c0_22, %c0_23] : memref<8x8x128xf32, #tpu.memory_space<vmem>>, vector<1x8x128xf32>
    %45 = vector.shape_cast %44 : vector<1x8x128xf32> to vector<8x128xf32>
    %46 = vector.shape_cast %26 : vector<8x128xf32> to vector<1x8x128xf32>
    tpu.vector_store %arg4[%43, %c0_22, %c0_23], %46 {strides = array<i32>} : memref<8x8x128xf32, #tpu.memory_space<vmem>>, vector<1x8x128xf32>,
    %c1_i32 = arith.constant 1 : i32
    %cst_24 = arith.constant 0.000000e+00 : f32
    %47 = vector.broadcast %cst_24 : f32 to vector<8x128xf32>
    %48 = arith.subf %47, %32 : vector<8x128xf32>
    %49 = arith.addf %48, %39 : vector<8x128xf32>
    %cst_25 = arith.constant 1.000000e-01 : f32
    %50 = vector.broadcast %cst_25 : f32 to vector<8x128xf32>
    %51 = arith.mulf %50, %49 : vector<8x128xf32>
    %52 = arith.addf %32, %51 : vector<8x128xf32>
    %cst_26 = arith.constant -2.000000e-01 : f32
    %53 = vector.broadcast %cst_26 : f32 to vector<8x128xf32>
    %54 = arith.mulf %53, %39 : vector<8x128xf32>
    %55 = arith.addf %39, %54 : vector<8x128xf32>
    %cst_27 = arith.constant 1.000000e+00 : f32
    %56 = vector.broadcast %cst_27 : f32 to vector<8x128xf32>
    %57 = arith.subf %56, %42 : vector<8x128xf32>
    %cst_28 = arith.constant 1.42857141E-6 : f32
    %58 = vector.broadcast %cst_28 : f32 to vector<8x128xf32>
    %59 = arith.mulf %58, %57 : vector<8x128xf32>
    %60 = arith.addf %42, %59 : vector<8x128xf32>
    %61 = arith.subf %52, %60 : vector<8x128xf32>
    %cst_29 = arith.constant 0.000000e+00 : f32
    %62 = vector.broadcast %cst_29 : f32 to vector<8x128xf32>
    %63 = arith.cmpf ogt, %61, %62 : vector<8x128xf32>
    %64 = arith.extui %63 : vector<8x128xi1> to vector<8x128xi32>
    %65 = arith.sitofp %64 : vector<8x128xi32> to vector<8x128xf32>
    %cst_30 = arith.constant 1.000000e+00 : f32
    %66 = vector.broadcast %cst_30 : f32 to vector<8x128xf32>
    %67 = arith.subf %66, %65 : vector<8x128xf32>
    %68 = arith.mulf %67, %52 : vector<8x128xf32>
    %cst_31 = arith.constant 0.000000e+00 : f32
    %69 = vector.broadcast %cst_31 : f32 to vector<8x128xf32>
    %70 = arith.mulf %65, %69 : vector<8x128xf32>
    %71 = arith.addf %68, %70 : vector<8x128xf32>
    %72 = arith.index_cast %c1_i32 : i32 to index
    %c0_32 = arith.constant 0 : index
    %c0_33 = arith.constant 0 : index
    %73 = vector.load %arg2[%72, %c0_32, %c0_33] : memref<8x8x128xf32, #tpu.memory_space<vmem>>, vector<1x8x128xf32>
    %74 = vector.shape_cast %73 : vector<1x8x128xf32> to vector<8x128xf32>
    %75 = arith.addf %55, %74 : vector<8x128xf32>
    %76 = arith.truncf %26 : vector<8x128xf32> to vector<8x128xbf16>
    %cst_34 = arith.constant dense<0.000000e+00> : vector<8x128xf32>
    %77 = tpu.matmul %76, %3, %cst_34 {dimension_numbers = #tpu.dot_dimension_numbers<[1], [0], [0], [1], [0, 0, 1, 1], [], []>} : vector<8x128xbf16>, vector<128x128xbf16>, vector<8x128xf32> -> vector<8x128xf32>
    %78 = arith.addf %75, %77 : vector<8x128xf32>
    %cst_35 = arith.constant 0.00257142866 : f32
    %79 = vector.broadcast %cst_35 : f32 to vector<8x128xf32>
    %80 = arith.mulf %65, %79 : vector<8x128xf32>
    %81 = arith.addf %60, %80 : vector<8x128xf32>
    %82 = arith.index_cast %c1_i32 : i32 to index
    %c0_36 = arith.constant 0 : index
    %c0_37 = arith.constant 0 : index
    %83 = vector.load %arg4[%82, %c0_36, %c0_37] : memref<8x8x128xf32, #tpu.memory_space<vmem>>, vector<1x8x128xf32>
    %84 = vector.shape_cast %83 : vector<1x8x128xf32> to vector<8x128xf32>
    %85 = vector.shape_cast %65 : vector<8x128xf32> to vector<1x8x128xf32>
    tpu.vector_store %arg4[%82, %c0_36, %c0_37], %85 {strides = array<i32>} : memref<8x8x128xf32, #tpu.memory_space<vmem>>, vector<1x8x128xf32>,
    %c2_i32 = arith.constant 2 : i32
    %cst_38 = arith.constant 0.000000e+00 : f32
    %86 = vector.broadcast %cst_38 : f32 to vector<8x128xf32>
    %87 = arith.subf %86, %71 : vector<8x128xf32>
    %88 = arith.addf %87, %78 : vector<8x128xf32>
    %cst_39 = arith.constant 1.000000e-01 : f32
    %89 = vector.broadcast %cst_39 : f32 to vector<8x128xf32>
    %90 = arith.mulf %89, %88 : vector<8x128xf32>
    %91 = arith.addf %71, %90 : vector<8x128xf32>
    %cst_40 = arith.constant -2.000000e-01 : f32
    %92 = vector.broadcast %cst_40 : f32 to vector<8x128xf32>
    %93 = arith.mulf %92, %78 : vector<8x128xf32>
    %94 = arith.addf %78, %93 : vector<8x128xf32>
    %cst_41 = arith.constant 1.000000e+00 : f32
    %95 = vector.broadcast %cst_41 : f32 to vector<8x128xf32>
    %96 = arith.subf %95, %81 : vector<8x128xf32>
    %cst_42 = arith.constant 1.42857141E-6 : f32
    %97 = vector.broadcast %cst_42 : f32 to vector<8x128xf32>
    %98 = arith.mulf %97, %96 : vector<8x128xf32>
    %99 = arith.addf %81, %98 : vector<8x128xf32>
    %100 = arith.subf %91, %99 : vector<8x128xf32>
    %cst_43 = arith.constant 0.000000e+00 : f32
    %101 = vector.broadcast %cst_43 : f32 to vector<8x128xf32>
    %102 = arith.cmpf ogt, %100, %101 : vector<8x128xf32>
    %103 = arith.extui %102 : vector<8x128xi1> to vector<8x128xi32>
    %104 = arith.sitofp %103 : vector<8x128xi32> to vector<8x128xf32>
    %cst_44 = arith.constant 1.000000e+00 : f32
    %105 = vector.broadcast %cst_44 : f32 to vector<8x128xf32>
    %106 = arith.subf %105, %104 : vector<8x128xf32>
    %107 = arith.mulf %106, %91 : vector<8x128xf32>
    %cst_45 = arith.constant 0.000000e+00 : f32
    %108 = vector.broadcast %cst_45 : f32 to vector<8x128xf32>
    %109 = arith.mulf %104, %108 : vector<8x128xf32>
    %110 = arith.addf %107, %109 : vector<8x128xf32>
    %111 = arith.index_cast %c2_i32 : i32 to index
    %c0_46 = arith.constant 0 : index
    %c0_47 = arith.constant 0 : index
    %112 = vector.load %arg2[%111, %c0_46, %c0_47] : memref<8x8x128xf32, #tpu.memory_space<vmem>>, vector<1x8x128xf32>
    %113 = vector.shape_cast %112 : vector<1x8x128xf32> to vector<8x128xf32>
    %114 = arith.addf %94, %113 : vector<8x128xf32>
    %115 = arith.truncf %65 : vector<8x128xf32> to vector<8x128xbf16>
    %cst_48 = arith.constant dense<0.000000e+00> : vector<8x128xf32>
    %116 = tpu.matmul %115, %3, %cst_48 {dimension_numbers = #tpu.dot_dimension_numbers<[1], [0], [0], [1], [0, 0, 1, 1], [], []>} : vector<8x128xbf16>, vector<128x128xbf16>, vector<8x128xf32> -> vector<8x128xf32>
    %117 = arith.addf %114, %116 : vector<8x128xf32>
    %cst_49 = arith.constant 0.00257142866 : f32
    %118 = vector.broadcast %cst_49 : f32 to vector<8x128xf32>
    %119 = arith.mulf %104, %118 : vector<8x128xf32>
    %120 = arith.addf %99, %119 : vector<8x128xf32>
    %121 = arith.index_cast %c2_i32 : i32 to index
    %c0_50 = arith.constant 0 : index
    %c0_51 = arith.constant 0 : index
    %122 = vector.load %arg4[%121, %c0_50, %c0_51] : memref<8x8x128xf32, #tpu.memory_space<vmem>>, vector<1x8x128xf32>
    %123 = vector.shape_cast %122 : vector<1x8x128xf32> to vector<8x128xf32>
    %124 = vector.shape_cast %104 : vector<8x128xf32> to vector<1x8x128xf32>
    tpu.vector_store %arg4[%121, %c0_50, %c0_51], %124 {strides = array<i32>} : memref<8x8x128xf32, #tpu.memory_space<vmem>>, vector<1x8x128xf32>,
    %c3_i32 = arith.constant 3 : i32
    %cst_52 = arith.constant 0.000000e+00 : f32
    %125 = vector.broadcast %cst_52 : f32 to vector<8x128xf32>
    %126 = arith.subf %125, %110 : vector<8x128xf32>
    %127 = arith.addf %126, %117 : vector<8x128xf32>
    %cst_53 = arith.constant 1.000000e-01 : f32
    %128 = vector.broadcast %cst_53 : f32 to vector<8x128xf32>
    %129 = arith.mulf %128, %127 : vector<8x128xf32>
    %130 = arith.addf %110, %129 : vector<8x128xf32>
    %cst_54 = arith.constant -2.000000e-01 : f32
    %131 = vector.broadcast %cst_54 : f32 to vector<8x128xf32>
    %132 = arith.mulf %131, %117 : vector<8x128xf32>
    %133 = arith.addf %117, %132 : vector<8x128xf32>
    %cst_55 = arith.constant 1.000000e+00 : f32
    %134 = vector.broadcast %cst_55 : f32 to vector<8x128xf32>
    %135 = arith.subf %134, %120 : vector<8x128xf32>
    %cst_56 = arith.constant 1.42857141E-6 : f32
    %136 = vector.broadcast %cst_56 : f32 to vector<8x128xf32>
    %137 = arith.mulf %136, %135 : vector<8x128xf32>
    %138 = arith.addf %120, %137 : vector<8x128xf32>
    %139 = arith.subf %130, %138 : vector<8x128xf32>
    %cst_57 = arith.constant 0.000000e+00 : f32
    %140 = vector.broadcast %cst_57 : f32 to vector<8x128xf32>
    %141 = arith.cmpf ogt, %139, %140 : vector<8x128xf32>
    %142 = arith.extui %141 : vector<8x128xi1> to vector<8x128xi32>
    %143 = arith.sitofp %142 : vector<8x128xi32> to vector<8x128xf32>
    %cst_58 = arith.constant 1.000000e+00 : f32
    %144 = vector.broadcast %cst_58 : f32 to vector<8x128xf32>
    %145 = arith.subf %144, %143 : vector<8x128xf32>
    %146 = arith.mulf %145, %130 : vector<8x128xf32>
    %cst_59 = arith.constant 0.000000e+00 : f32
    %147 = vector.broadcast %cst_59 : f32 to vector<8x128xf32>
    %148 = arith.mulf %143, %147 : vector<8x128xf32>
    %149 = arith.addf %146, %148 : vector<8x128xf32>
    %150 = arith.index_cast %c3_i32 : i32 to index
    %c0_60 = arith.constant 0 : index
    %c0_61 = arith.constant 0 : index
    %151 = vector.load %arg2[%150, %c0_60, %c0_61] : memref<8x8x128xf32, #tpu.memory_space<vmem>>, vector<1x8x128xf32>
    %152 = vector.shape_cast %151 : vector<1x8x128xf32> to vector<8x128xf32>
    %153 = arith.addf %133, %152 : vector<8x128xf32>
    %154 = arith.truncf %104 : vector<8x128xf32> to vector<8x128xbf16>
    %cst_62 = arith.constant dense<0.000000e+00> : vector<8x128xf32>
    %155 = tpu.matmul %154, %3, %cst_62 {dimension_numbers = #tpu.dot_dimension_numbers<[1], [0], [0], [1], [0, 0, 1, 1], [], []>} : vector<8x128xbf16>, vector<128x128xbf16>, vector<8x128xf32> -> vector<8x128xf32>
    %156 = arith.addf %153, %155 : vector<8x128xf32>
    %cst_63 = arith.constant 0.00257142866 : f32
    %157 = vector.broadcast %cst_63 : f32 to vector<8x128xf32>
    %158 = arith.mulf %143, %157 : vector<8x128xf32>
    %159 = arith.addf %138, %158 : vector<8x128xf32>
    %160 = arith.index_cast %c3_i32 : i32 to index
    %c0_64 = arith.constant 0 : index
    %c0_65 = arith.constant 0 : index
    %161 = vector.load %arg4[%160, %c0_64, %c0_65] : memref<8x8x128xf32, #tpu.memory_space<vmem>>, vector<1x8x128xf32>
    %162 = vector.shape_cast %161 : vector<1x8x128xf32> to vector<8x128xf32>
    %163 = vector.shape_cast %143 : vector<8x128xf32> to vector<1x8x128xf32>
    tpu.vector_store %arg4[%160, %c0_64, %c0_65], %163 {strides = array<i32>} : memref<8x8x128xf32, #tpu.memory_space<vmem>>, vector<1x8x128xf32>,
    %c4_i32 = arith.constant 4 : i32
    %cst_66 = arith.constant 0.000000e+00 : f32
    %164 = vector.broadcast %cst_66 : f32 to vector<8x128xf32>
    %165 = arith.subf %164, %149 : vector<8x128xf32>
    %166 = arith.addf %165, %156 : vector<8x128xf32>
    %cst_67 = arith.constant 1.000000e-01 : f32
    %167 = vector.broadcast %cst_67 : f32 to vector<8x128xf32>
    %168 = arith.mulf %167, %166 : vector<8x128xf32>
    %169 = arith.addf %149, %168 : vector<8x128xf32>
    %cst_68 = arith.constant -2.000000e-01 : f32
    %170 = vector.broadcast %cst_68 : f32 to vector<8x128xf32>
    %171 = arith.mulf %170, %156 : vector<8x128xf32>
    %172 = arith.addf %156, %171 : vector<8x128xf32>
    %cst_69 = arith.constant 1.000000e+00 : f32
    %173 = vector.broadcast %cst_69 : f32 to vector<8x128xf32>
    %174 = arith.subf %173, %159 : vector<8x128xf32>
    %cst_70 = arith.constant 1.42857141E-6 : f32
    %175 = vector.broadcast %cst_70 : f32 to vector<8x128xf32>
    %176 = arith.mulf %175, %174 : vector<8x128xf32>
    %177 = arith.addf %159, %176 : vector<8x128xf32>
    %178 = arith.subf %169, %177 : vector<8x128xf32>
    %cst_71 = arith.constant 0.000000e+00 : f32
    %179 = vector.broadcast %cst_71 : f32 to vector<8x128xf32>
    %180 = arith.cmpf ogt, %178, %179 : vector<8x128xf32>
    %181 = arith.extui %180 : vector<8x128xi1> to vector<8x128xi32>
    %182 = arith.sitofp %181 : vector<8x128xi32> to vector<8x128xf32>
    %cst_72 = arith.constant 1.000000e+00 : f32
    %183 = vector.broadcast %cst_72 : f32 to vector<8x128xf32>
    %184 = arith.subf %183, %182 : vector<8x128xf32>
    %185 = arith.mulf %184, %169 : vector<8x128xf32>
    %cst_73 = arith.constant 0.000000e+00 : f32
    %186 = vector.broadcast %cst_73 : f32 to vector<8x128xf32>
    %187 = arith.mulf %182, %186 : vector<8x128xf32>
    %188 = arith.addf %185, %187 : vector<8x128xf32>
    %189 = arith.index_cast %c4_i32 : i32 to index
    %c0_74 = arith.constant 0 : index
    %c0_75 = arith.constant 0 : index
    %190 = vector.load %arg2[%189, %c0_74, %c0_75] : memref<8x8x128xf32, #tpu.memory_space<vmem>>, vector<1x8x128xf32>
    %191 = vector.shape_cast %190 : vector<1x8x128xf32> to vector<8x128xf32>
    %192 = arith.addf %172, %191 : vector<8x128xf32>
    %193 = arith.truncf %143 : vector<8x128xf32> to vector<8x128xbf16>
    %cst_76 = arith.constant dense<0.000000e+00> : vector<8x128xf32>
    %194 = tpu.matmul %193, %3, %cst_76 {dimension_numbers = #tpu.dot_dimension_numbers<[1], [0], [0], [1], [0, 0, 1, 1], [], []>} : vector<8x128xbf16>, vector<128x128xbf16>, vector<8x128xf32> -> vector<8x128xf32>
    %195 = arith.addf %192, %194 : vector<8x128xf32>
    %cst_77 = arith.constant 0.00257142866 : f32
    %196 = vector.broadcast %cst_77 : f32 to vector<8x128xf32>
    %197 = arith.mulf %182, %196 : vector<8x128xf32>
    %198 = arith.addf %177, %197 : vector<8x128xf32>
    %199 = arith.index_cast %c4_i32 : i32 to index
    %c0_78 = arith.constant 0 : index
    %c0_79 = arith.constant 0 : index
    %200 = vector.load %arg4[%199, %c0_78, %c0_79] : memref<8x8x128xf32, #tpu.memory_space<vmem>>, vector<1x8x128xf32>
    %201 = vector.shape_cast %200 : vector<1x8x128xf32> to vector<8x128xf32>
    %202 = vector.shape_cast %182 : vector<8x128xf32> to vector<1x8x128xf32>
    tpu.vector_store %arg4[%199, %c0_78, %c0_79], %202 {strides = array<i32>} : memref<8x8x128xf32, #tpu.memory_space<vmem>>, vector<1x8x128xf32>,
    %c5_i32 = arith.constant 5 : i32
    %cst_80 = arith.constant 0.000000e+00 : f32
    %203 = vector.broadcast %cst_80 : f32 to vector<8x128xf32>
    %204 = arith.subf %203, %188 : vector<8x128xf32>
    %205 = arith.addf %204, %195 : vector<8x128xf32>
    %cst_81 = arith.constant 1.000000e-01 : f32
    %206 = vector.broadcast %cst_81 : f32 to vector<8x128xf32>
    %207 = arith.mulf %206, %205 : vector<8x128xf32>
    %208 = arith.addf %188, %207 : vector<8x128xf32>
    %cst_82 = arith.constant -2.000000e-01 : f32
    %209 = vector.broadcast %cst_82 : f32 to vector<8x128xf32>
    %210 = arith.mulf %209, %195 : vector<8x128xf32>
    %211 = arith.addf %195, %210 : vector<8x128xf32>
    %cst_83 = arith.constant 1.000000e+00 : f32
    %212 = vector.broadcast %cst_83 : f32 to vector<8x128xf32>
    %213 = arith.subf %212, %198 : vector<8x128xf32>
    %cst_84 = arith.constant 1.42857141E-6 : f32
    %214 = vector.broadcast %cst_84 : f32 to vector<8x128xf32>
    %215 = arith.mulf %214, %213 : vector<8x128xf32>
    %216 = arith.addf %198, %215 : vector<8x128xf32>
    %217 = arith.subf %208, %216 : vector<8x128xf32>
    %cst_85 = arith.constant 0.000000e+00 : f32
    %218 = vector.broadcast %cst_85 : f32 to vector<8x128xf32>
    %219 = arith.cmpf ogt, %217, %218 : vector<8x128xf32>
    %220 = arith.extui %219 : vector<8x128xi1> to vector<8x128xi32>
    %221 = arith.sitofp %220 : vector<8x128xi32> to vector<8x128xf32>
    %cst_86 = arith.constant 1.000000e+00 : f32
    %222 = vector.broadcast %cst_86 : f32 to vector<8x128xf32>
    %223 = arith.subf %222, %221 : vector<8x128xf32>
    %224 = arith.mulf %223, %208 : vector<8x128xf32>
    %cst_87 = arith.constant 0.000000e+00 : f32
    %225 = vector.broadcast %cst_87 : f32 to vector<8x128xf32>
    %226 = arith.mulf %221, %225 : vector<8x128xf32>
    %227 = arith.addf %224, %226 : vector<8x128xf32>
    %228 = arith.index_cast %c5_i32 : i32 to index
    %c0_88 = arith.constant 0 : index
    %c0_89 = arith.constant 0 : index
    %229 = vector.load %arg2[%228, %c0_88, %c0_89] : memref<8x8x128xf32, #tpu.memory_space<vmem>>, vector<1x8x128xf32>
    %230 = vector.shape_cast %229 : vector<1x8x128xf32> to vector<8x128xf32>
    %231 = arith.addf %211, %230 : vector<8x128xf32>
    %232 = arith.truncf %182 : vector<8x128xf32> to vector<8x128xbf16>
    %cst_90 = arith.constant dense<0.000000e+00> : vector<8x128xf32>
    %233 = tpu.matmul %232, %3, %cst_90 {dimension_numbers = #tpu.dot_dimension_numbers<[1], [0], [0], [1], [0, 0, 1, 1], [], []>} : vector<8x128xbf16>, vector<128x128xbf16>, vector<8x128xf32> -> vector<8x128xf32>
    %234 = arith.addf %231, %233 : vector<8x128xf32>
    %cst_91 = arith.constant 0.00257142866 : f32
    %235 = vector.broadcast %cst_91 : f32 to vector<8x128xf32>
    %236 = arith.mulf %221, %235 : vector<8x128xf32>
    %237 = arith.addf %216, %236 : vector<8x128xf32>
    %238 = arith.index_cast %c5_i32 : i32 to index
    %c0_92 = arith.constant 0 : index
    %c0_93 = arith.constant 0 : index
    %239 = vector.load %arg4[%238, %c0_92, %c0_93] : memref<8x8x128xf32, #tpu.memory_space<vmem>>, vector<1x8x128xf32>
    %240 = vector.shape_cast %239 : vector<1x8x128xf32> to vector<8x128xf32>
    %241 = vector.shape_cast %221 : vector<8x128xf32> to vector<1x8x128xf32>
    tpu.vector_store %arg4[%238, %c0_92, %c0_93], %241 {strides = array<i32>} : memref<8x8x128xf32, #tpu.memory_space<vmem>>, vector<1x8x128xf32>,
    %c6_i32 = arith.constant 6 : i32
    %cst_94 = arith.constant 0.000000e+00 : f32
    %242 = vector.broadcast %cst_94 : f32 to vector<8x128xf32>
    %243 = arith.subf %242, %227 : vector<8x128xf32>
    %244 = arith.addf %243, %234 : vector<8x128xf32>
    %cst_95 = arith.constant 1.000000e-01 : f32
    %245 = vector.broadcast %cst_95 : f32 to vector<8x128xf32>
    %246 = arith.mulf %245, %244 : vector<8x128xf32>
    %247 = arith.addf %227, %246 : vector<8x128xf32>
    %cst_96 = arith.constant -2.000000e-01 : f32
    %248 = vector.broadcast %cst_96 : f32 to vector<8x128xf32>
    %249 = arith.mulf %248, %234 : vector<8x128xf32>
    %250 = arith.addf %234, %249 : vector<8x128xf32>
    %cst_97 = arith.constant 1.000000e+00 : f32
    %251 = vector.broadcast %cst_97 : f32 to vector<8x128xf32>
    %252 = arith.subf %251, %237 : vector<8x128xf32>
    %cst_98 = arith.constant 1.42857141E-6 : f32
    %253 = vector.broadcast %cst_98 : f32 to vector<8x128xf32>
    %254 = arith.mulf %253, %252 : vector<8x128xf32>
    %255 = arith.addf %237, %254 : vector<8x128xf32>
    %256 = arith.subf %247, %255 : vector<8x128xf32>
    %cst_99 = arith.constant 0.000000e+00 : f32
    %257 = vector.broadcast %cst_99 : f32 to vector<8x128xf32>
    %258 = arith.cmpf ogt, %256, %257 : vector<8x128xf32>
    %259 = arith.extui %258 : vector<8x128xi1> to vector<8x128xi32>
    %260 = arith.sitofp %259 : vector<8x128xi32> to vector<8x128xf32>
    %cst_100 = arith.constant 1.000000e+00 : f32
    %261 = vector.broadcast %cst_100 : f32 to vector<8x128xf32>
    %262 = arith.subf %261, %260 : vector<8x128xf32>
    %263 = arith.mulf %262, %247 : vector<8x128xf32>
    %cst_101 = arith.constant 0.000000e+00 : f32
    %264 = vector.broadcast %cst_101 : f32 to vector<8x128xf32>
    %265 = arith.mulf %260, %264 : vector<8x128xf32>
    %266 = arith.addf %263, %265 : vector<8x128xf32>
    %267 = arith.index_cast %c6_i32 : i32 to index
    %c0_102 = arith.constant 0 : index
    %c0_103 = arith.constant 0 : index
    %268 = vector.load %arg2[%267, %c0_102, %c0_103] : memref<8x8x128xf32, #tpu.memory_space<vmem>>, vector<1x8x128xf32>
    %269 = vector.shape_cast %268 : vector<1x8x128xf32> to vector<8x128xf32>
    %270 = arith.addf %250, %269 : vector<8x128xf32>
    %271 = arith.truncf %221 : vector<8x128xf32> to vector<8x128xbf16>
    %cst_104 = arith.constant dense<0.000000e+00> : vector<8x128xf32>
    %272 = tpu.matmul %271, %3, %cst_104 {dimension_numbers = #tpu.dot_dimension_numbers<[1], [0], [0], [1], [0, 0, 1, 1], [], []>} : vector<8x128xbf16>, vector<128x128xbf16>, vector<8x128xf32> -> vector<8x128xf32>
    %273 = arith.addf %270, %272 : vector<8x128xf32>
    %cst_105 = arith.constant 0.00257142866 : f32
    %274 = vector.broadcast %cst_105 : f32 to vector<8x128xf32>
    %275 = arith.mulf %260, %274 : vector<8x128xf32>
    %276 = arith.addf %255, %275 : vector<8x128xf32>
    %277 = arith.index_cast %c6_i32 : i32 to index
    %c0_106 = arith.constant 0 : index
    %c0_107 = arith.constant 0 : index
    %278 = vector.load %arg4[%277, %c0_106, %c0_107] : memref<8x8x128xf32, #tpu.memory_space<vmem>>, vector<1x8x128xf32>
    %279 = vector.shape_cast %278 : vector<1x8x128xf32> to vector<8x128xf32>
    %280 = vector.shape_cast %260 : vector<8x128xf32> to vector<1x8x128xf32>
    tpu.vector_store %arg4[%277, %c0_106, %c0_107], %280 {strides = array<i32>} : memref<8x8x128xf32, #tpu.memory_space<vmem>>, vector<1x8x128xf32>,
    %c7_i32 = arith.constant 7 : i32
    %cst_108 = arith.constant 0.000000e+00 : f32
    %281 = vector.broadcast %cst_108 : f32 to vector<8x128xf32>
    %282 = arith.subf %281, %266 : vector<8x128xf32>
    %283 = arith.addf %282, %273 : vector<8x128xf32>
    %cst_109 = arith.constant 1.000000e-01 : f32
    %284 = vector.broadcast %cst_109 : f32 to vector<8x128xf32>
    %285 = arith.mulf %284, %283 : vector<8x128xf32>
    %286 = arith.addf %266, %285 : vector<8x128xf32>
    %cst_110 = arith.constant -2.000000e-01 : f32
    %287 = vector.broadcast %cst_110 : f32 to vector<8x128xf32>
    %288 = arith.mulf %287, %273 : vector<8x128xf32>
    %289 = arith.addf %273, %288 : vector<8x128xf32>
    %cst_111 = arith.constant 1.000000e+00 : f32
    %290 = vector.broadcast %cst_111 : f32 to vector<8x128xf32>
    %291 = arith.subf %290, %276 : vector<8x128xf32>
    %cst_112 = arith.constant 1.42857141E-6 : f32
    %292 = vector.broadcast %cst_112 : f32 to vector<8x128xf32>
    %293 = arith.mulf %292, %291 : vector<8x128xf32>
    %294 = arith.addf %276, %293 : vector<8x128xf32>
    %295 = arith.subf %286, %294 : vector<8x128xf32>
    %cst_113 = arith.constant 0.000000e+00 : f32
    %296 = vector.broadcast %cst_113 : f32 to vector<8x128xf32>
    %297 = arith.cmpf ogt, %295, %296 : vector<8x128xf32>
    %298 = arith.extui %297 : vector<8x128xi1> to vector<8x128xi32>
    %299 = arith.sitofp %298 : vector<8x128xi32> to vector<8x128xf32>
    %cst_114 = arith.constant 1.000000e+00 : f32
    %300 = vector.broadcast %cst_114 : f32 to vector<8x128xf32>
    %301 = arith.subf %300, %299 : vector<8x128xf32>
    %302 = arith.mulf %301, %286 : vector<8x128xf32>
    %cst_115 = arith.constant 0.000000e+00 : f32
    %303 = vector.broadcast %cst_115 : f32 to vector<8x128xf32>
    %304 = arith.mulf %299, %303 : vector<8x128xf32>
    %305 = arith.addf %302, %304 : vector<8x128xf32>
    %306 = arith.index_cast %c7_i32 : i32 to index
    %c0_116 = arith.constant 0 : index
    %c0_117 = arith.constant 0 : index
    %307 = vector.load %arg2[%306, %c0_116, %c0_117] : memref<8x8x128xf32, #tpu.memory_space<vmem>>, vector<1x8x128xf32>
    %308 = vector.shape_cast %307 : vector<1x8x128xf32> to vector<8x128xf32>
    %309 = arith.addf %289, %308 : vector<8x128xf32>
    %310 = arith.truncf %260 : vector<8x128xf32> to vector<8x128xbf16>
    %cst_118 = arith.constant dense<0.000000e+00> : vector<8x128xf32>
    %311 = tpu.matmul %310, %3, %cst_118 {dimension_numbers = #tpu.dot_dimension_numbers<[1], [0], [0], [1], [0, 0, 1, 1], [], []>} : vector<8x128xbf16>, vector<128x128xbf16>, vector<8x128xf32> -> vector<8x128xf32>
    %312 = arith.addf %309, %311 : vector<8x128xf32>
    %cst_119 = arith.constant 0.00257142866 : f32
    %313 = vector.broadcast %cst_119 : f32 to vector<8x128xf32>
    %314 = arith.mulf %299, %313 : vector<8x128xf32>
    %315 = arith.addf %294, %314 : vector<8x128xf32>
    %316 = arith.index_cast %c7_i32 : i32 to index
    %c0_120 = arith.constant 0 : index
    %c0_121 = arith.constant 0 : index
    %317 = vector.load %arg4[%316, %c0_120, %c0_121] : memref<8x8x128xf32, #tpu.memory_space<vmem>>, vector<1x8x128xf32>
    %318 = vector.shape_cast %317 : vector<1x8x128xf32> to vector<8x128xf32>
    %319 = vector.shape_cast %299 : vector<8x128xf32> to vector<1x8x128xf32>
    tpu.vector_store %arg4[%316, %c0_120, %c0_121], %319 {strides = array<i32>} : memref<8x8x128xf32, #tpu.memory_space<vmem>>, vector<1x8x128xf32>,
    %c8_i32 = arith.constant 8 : i32
    %c0_122 = arith.constant 0 : index
    %c0_123 = arith.constant 0 : index
    %320 = vector.load %arg5[%c0_122, %c0_123] : memref<8x128xf32, #tpu.memory_space<vmem>>, vector<8x128xf32>
    tpu.vector_store %arg5[%c0_122, %c0_123], %299 {strides = array<i32>} : memref<8x128xf32, #tpu.memory_space<vmem>>, vector<8x128xf32>,
    %c0_124 = arith.constant 0 : index
    %c0_125 = arith.constant 0 : index
    %321 = vector.load %arg6[%c0_124, %c0_125] : memref<8x128xf32, #tpu.memory_space<vmem>>, vector<8x128xf32>
    tpu.vector_store %arg6[%c0_124, %c0_125], %305 {strides = array<i32>} : memref<8x128xf32, #tpu.memory_space<vmem>>, vector<8x128xf32>,
    %c0_126 = arith.constant 0 : index
    %c0_127 = arith.constant 0 : index
    %322 = vector.load %arg7[%c0_126, %c0_127] : memref<8x128xf32, #tpu.memory_space<vmem>>, vector<8x128xf32>
    tpu.vector_store %arg7[%c0_126, %c0_127], %312 {strides = array<i32>} : memref<8x128xf32, #tpu.memory_space<vmem>>, vector<8x128xf32>,
    %c0_128 = arith.constant 0 : index
    %c0_129 = arith.constant 0 : index
    %323 = vector.load %arg8[%c0_128, %c0_129] : memref<8x128xf32, #tpu.memory_space<vmem>>, vector<8x128xf32>
    tpu.vector_store %arg8[%c0_128, %c0_129], %315 {strides = array<i32>} : memref<8x128xf32, #tpu.memory_space<vmem>>, vector<8x128xf32>,
    return
  }
  func.func @transform_0(%arg0: i32, %arg1: i32) -> (i32, i32, i32) {
    %c0_i32 = arith.constant 0 : i32
    %c0_i32_0 = arith.constant 0 : i32
    return %arg1, %arg0, %c0_i32 : i32, i32, i32
  }
  func.func @transform_1(%arg0: i32, %arg1: i32) -> (i32, i32) {
    %c0_i32 = arith.constant 0 : i32
    %c0_i32_0 = arith.constant 0 : i32
    %c0_i32_1 = arith.constant 0 : i32
    return %c0_i32, %c0_i32_0 : i32, i32
  }
  func.func @transform_2(%arg0: i32, %arg1: i32) -> (i32, i32, i32) {
    %c0_i32 = arith.constant 0 : i32
    %c0_i32_0 = arith.constant 0 : i32
    return %arg1, %arg0, %c0_i32 : i32, i32, i32
  }
  func.func @transform_3(%arg0: i32, %arg1: i32) -> (i32, i32) {
    %c0_i32 = arith.constant 0 : i32
    %c0_i32_0 = arith.constant 0 : i32
    return %arg0, %c0_i32 : i32, i32
  }
  func.func @transform_4(%arg0: i32, %arg1: i32) -> (i32, i32) {
    %c0_i32 = arith.constant 0 : i32
    %c0_i32_0 = arith.constant 0 : i32
    return %arg0, %c0_i32 : i32, i32
  }
  func.func @transform_5(%arg0: i32, %arg1: i32) -> (i32, i32) {
    %c0_i32 = arith.constant 0 : i32
    %c0_i32_0 = arith.constant 0 : i32
    return %arg0, %c0_i32 : i32, i32
  }
  func.func @transform_6(%arg0: i32, %arg1: i32) -> (i32, i32) {
    %c0_i32 = arith.constant 0 : i32
    %c0_i32_0 = arith.constant 0 : i32
    return %arg0, %c0_i32 : i32, i32
  }
}

</mosaic_0001>

<bundles_post_ra>
// kernel: lsnn_layer_forward.1
= control target key start
LH: loop header
LB: loop body
LE: loop exit
PB: predicated region body
PF: predicated region fallthrough
CT: control target
= control target key end

     0   :  { %v931_v0 = vmov 0.0   ;;  %vm932_vm0 = vmmov 0   ;;  %v933_v9 = vmov 0.0|0.0   ;;  %v934_v10 = vmov 1.0|1.0   ;;  %s1236_s1 = inlined_call_operand.vmem [shape: bf16[128,128], index: 1, kind: input, shape index: {}]   ;;  %s1237_s2 = inlined_call_operand.vmem [shape: f32[8,8,128], index: 2, kind: output, shape index: {0}]   ;;  %s1238_s0 = inlined_call_operand.vmem [shape: f32[8,8,128], index: 0, kind: input, shape index: {}]   ;;  %s1239_s3 = inlined_call_operand.vmem [shape: f32[8,128], index: 3, kind: output, shape index: {1}]   ;;  %s1240_s6 = inlined_call_operand.vmem [shape: f32[8,128], index: 6, kind: output, shape index: {4}]   ;;  %s1241_s4 = inlined_call_operand.vmem [shape: f32[8,128], index: 4, kind: output, shape index: {2}]   ;;  %s1242_s5 = inlined_call_operand.vmem [shape: f32[8,128], index: 5, kind: output, shape index: {3}]  }
   0x1   :  { %759 = vmatprep.subr.bf16.mxu0 %v931_v0  ;;  %v974_v1 = vld [vmem:[%s1236_s1] sm:$0xff]   ;;  %779 = vmatprep.subr.bf16.mxu1 %v931_v0  ;;  %v985_v2 = vld [vmem:[%s1236_s1 + $0x8] sm:$0xff]   ;;  %v994_v3 = vld [vmem:[%s1236_s1 + $0x10] sm:$0xff]   ;;  %156 = vst [vmem:[%s1237_s2] sm:$0xff] %v931_v0 }
   0x2   :  { %775 = vmatprep.mubr.msk.bf16.mxu0 %vm932_vm0, %v931_v0  ;;  %795 = vmatprep.mubr.msk.bf16.mxu1 %vm932_vm0, %v931_v0  ;;  %v1003_v4 = vld [vmem:[%s1236_s1 + $0x18] sm:$0xff]   ;;  %v1012_v5 = vld [vmem:[%s1236_s1 + $0x20] sm:$0xff]   ;;  %v1025_v6 = vld [vmem:[%s1236_s1 + $0x28] sm:$0xff]  }
   0x3   :  { %760 = vmatpush3.bf16.msra.mxu0 %v974_v1  ;;  %780 = vmatpush3.bf16.msra.mxu1 %v974_v1  ;;  %v1034_v7 = vld [vmem:[%s1236_s1 + $0x30] sm:$0xff]   ;;  %v1043_v8 = vld [vmem:[%s1236_s1 + $0x38] sm:$0xff]   ;;  %vm654_vm1 = vmpackc.low %vm932_vm0, %vm932_vm0 }
   0x4   :  { %761 = vmatprep.subr.bf16.mxu0 %v931_v0  ;;  %781 = vmatprep.subr.bf16.mxu1 %v931_v0  ;;  %v62_v11 = vld [vmem:[%s1238_s0] sm:$0xff]  ;;  %v653_v22 = vld [vmem:[%s1238_s0 + $0x8] sm:$0xff]  ;;  %v658_v52 = vld [vmem:[%s1238_s0 + $0x10] sm:$0xff] }
   0x7   :  { %762 = vmatpush3.bf16.msra.mxu0 %v985_v2  ;;  %782 = vmatpush3.bf16.msra.mxu1 %v985_v2 }
   0x8   :  { %763 = vmatprep.subr.bf16.mxu0 %v931_v0  ;;  %783 = vmatprep.subr.bf16.mxu1 %v931_v0 }
   0xb   :  { %764 = vmatpush3.bf16.msra.mxu0 %v994_v3  ;;  %784 = vmatpush3.bf16.msra.mxu1 %v994_v3 }
   0xc   :  { %765 = vmatprep.subr.bf16.mxu0 %v931_v0  ;;  %785 = vmatprep.subr.bf16.mxu1 %v931_v0 }
   0xf   :  { %766 = vmatpush3.bf16.msra.mxu0 %v1003_v4  ;;  %786 = vmatpush3.bf16.msra.mxu1 %v1003_v4 }
  0x10   :  { %767 = vmatprep.subr.bf16.mxu0 %v931_v0  ;;  %787 = vmatprep.subr.bf16.mxu1 %v931_v0 }
  0x13   :  { %768 = vmatpush3.bf16.msra.mxu0 %v1012_v5  ;;  %788 = vmatpush3.bf16.msra.mxu1 %v1012_v5 }
  0x14   :  { %769 = vmatprep.subr.bf16.mxu0 %v931_v0  ;;  %789 = vmatprep.subr.bf16.mxu1 %v931_v0 }
  0x17   :  { %770 = vmatpush3.bf16.msra.mxu0 %v1025_v6  ;;  %790 = vmatpush3.bf16.msra.mxu1 %v1025_v6 }
  0x18   :  { %771 = vmatprep.subr.bf16.mxu0 %v931_v0  ;;  %791 = vmatprep.subr.bf16.mxu1 %v931_v0 }
  0x1b   :  { %772 = vmatpush3.bf16.msra.mxu0 %v1034_v7  ;;  %792 = vmatpush3.bf16.msra.mxu1 %v1034_v7 }
  0x1c   :  { %773 = vmatprep.subr.bf16.mxu0 %v931_v0  ;;  %793 = vmatprep.subr.bf16.mxu1 %v931_v0 }
  0x1f   :  { %774 = vmatpush3.bf16.msra.mxu0 %v1043_v8  ;;  %794 = vmatpush3.bf16.msra.mxu1 %v1043_v8 }
  0x20   :  { %799 = vmatprep.subr.bf16.mxu0 %v931_v0  ;;  %819 = vmatprep.subr.bf16.mxu1 %v931_v0 }
  0x22   :  { %776 = vmatmul.mubr.bf16.vlgmr.msra.gmra.mrb[0].mxu0 %v933_v9  ;;  %796 = vmatmul.mubr.msk.bf16.vlgmr.msra.gmra.mrb[0].mxu1 %vm654_vm1, %v934_v10 }
  0x23   :  { %800 = vmatpush3.bf16.msra.mxu0 %v974_v1  ;;  %820 = vmatpush3.bf16.msra.mxu1 %v974_v1 }
  0x24   :  { %801 = vmatprep.subr.bf16.mxu0 %v931_v0  ;;  %821 = vmatprep.subr.bf16.mxu1 %v931_v0 }
  0x25   :  { %815 = vmatprep.mubr.msk.bf16.mxu0 %vm932_vm0, %v931_v0  ;;  %835 = vmatprep.mubr.msk.bf16.mxu1 %vm932_vm0, %v931_v0 }
  0x27   :  { %802 = vmatpush3.bf16.msra.mxu0 %v985_v2  ;;  %822 = vmatpush3.bf16.msra.mxu1 %v985_v2 }
  0x28   :  { %803 = vmatprep.subr.bf16.mxu0 %v931_v0  ;;  %823 = vmatprep.subr.bf16.mxu1 %v931_v0 }
  0x2b   :  { %804 = vmatpush3.bf16.msra.mxu0 %v994_v3  ;;  %824 = vmatpush3.bf16.msra.mxu1 %v994_v3 }
  0x2c   :  { %805 = vmatprep.subr.bf16.mxu0 %v931_v0  ;;  %825 = vmatprep.subr.bf16.mxu1 %v931_v0 }
  0x2f   :  { %806 = vmatpush3.bf16.msra.mxu0 %v1003_v4  ;;  %826 = vmatpush3.bf16.msra.mxu1 %v1003_v4 }
  0x30   :  { %807 = vmatprep.subr.bf16.mxu0 %v931_v0  ;;  %827 = vmatprep.subr.bf16.mxu1 %v931_v0 }
  0x33   :  { %808 = vmatpush3.bf16.msra.mxu0 %v1012_v5  ;;  %828 = vmatpush3.bf16.msra.mxu1 %v1012_v5 }
  0x34   :  { %809 = vmatprep.subr.bf16.mxu0 %v931_v0  ;;  %829 = vmatprep.subr.bf16.mxu1 %v931_v0 }
  0x37   :  { %810 = vmatpush3.bf16.msra.mxu0 %v1025_v6  ;;  %830 = vmatpush3.bf16.msra.mxu1 %v1025_v6 }
  0x38   :  { %811 = vmatprep.subr.bf16.mxu0 %v931_v0  ;;  %831 = vmatprep.subr.bf16.mxu1 %v931_v0 }
  0x3b   :  { %812 = vmatpush3.bf16.msra.mxu0 %v1034_v7  ;;  %832 = vmatpush3.bf16.msra.mxu1 %v1034_v7 }
  0x3c   :  { %813 = vmatprep.subr.bf16.mxu0 %v931_v0  ;;  %833 = vmatprep.subr.bf16.mxu1 %v931_v0 }
  0x3f   :  { %814 = vmatpush3.bf16.msra.mxu0 %v1043_v8  ;;  %834 = vmatpush3.bf16.msra.mxu1 %v1043_v8 }
  0x40   :  { %839 = vmatprep.subr.bf16.mxu0 %v931_v0  ;;  %859 = vmatprep.subr.bf16.mxu1 %v931_v0 }
  0xf5   :  { %v147_v12 = vpop.f32.mrb[0].mxu0  ;;  %v212_v13 = vpop.f32.mrb[0].mxu1 }
  0xf6   :  { %v153_v14 = vadd.f32 %v147_v12, %v62_v11  ;;  %v777_v15 = vpop.f32.mrb[1].mxu0  ;;  %v797_v16 = vpop.f32.mrb[1].mxu1 }
  0xf7   :  { %v150_v17 = vpop.f32.mrb[2].mxu0  ;;  %v215_v18 = vpop.f32.mrb[2].mxu1 }
  0xf8   :  { %v161_v19 = vmul.f32 -0.2, %v153_v14  ;;  %v778_v20 = vpop.f32.mrb[3].mxu0  ;;  %v798_v21 = vpop.f32.mrb[3].mxu1  ;;  %v159_v23 = vmul.f32 0.1, %v153_v14 }
  0xf9   :  { %v663_v18 = vld [vmem:[%s1238_s0 + $0x18] sm:$0xff] }
  0xfa   :  { %v162_v24 = vadd.f32 %v161_v19, %v153_v14  ;;  %v930_v26 = vadd.f32 -2.8571408e-06, %v159_v23 }
  0xfc   :  { %v176_v25 = vadd.f32 %v653_v22, %v162_v24  ;;  %vm167_vm2 = vcmp.gt.f32.partialorder %v930_v26, 0.0 }
  0xfd   :  { %v652_v28 = vsel %vm167_vm2, 1.0, %v931_v0  ;;  %vm659_vm3 = vmpackc.low %vm167_vm2, %vm167_vm2 }
  0xfe   :  { %v1097_v27 = vadd.f32 %v212_v13, %v176_v25  ;;  %v170_v29 = vsub.f32 1.0, %v652_v28  ;;  %656 = vst [vmem:[%s1237_s2 + $0x8] sm:$0xff] %v652_v28  ;;  %816 = vmatmul.mubr.msk.bf16.vlgmr.msra.gmra.mrb[4].mxu0 %vm659_vm3, %v934_v10  ;;  %v219_v30 = vmul.f32 0.0025714287, %v652_v28  ;;  %v172_v32 = vmul.f32 0.0, %v652_v28 }
  0xff   :  { %840 = vmatpush3.bf16.msra.mxu0 %v974_v1  ;;  %855 = vmatprep.mubr.msk.bf16.mxu0 %vm932_vm0, %v931_v0 }
 0x100   :  { %v171_v31 = vmul.f32 %v170_v29, %v159_v23  ;;  %v220_v33 = vadd.f32 2.8571408e-06, %v219_v30  ;;  %841 = vmatprep.subr.bf16.mxu0 %v931_v0  ;;  %v227_v50 = vmul.f32 -0.2, %v1097_v27 }
 0x102   :  { %v173_v34 = vadd.f32 %v172_v32, %v171_v31  ;;  %v229_v35 = vsub.f32 1.0, %v220_v33  ;;  %v228_v51 = vadd.f32 %v227_v50, %v1097_v27 }
 0x103   :  { %842 = vmatpush3.bf16.msra.mxu0 %v985_v2 }
 0x104   :  { %v223_v36 = vsub.f32 0.0, %v173_v34  ;;  %843 = vmatprep.subr.bf16.mxu0 %v931_v0  ;;  %v230_v38 = vmul.f32 1.4285714e-06, %v229_v35  ;;  %v242_v53 = vadd.f32 %v658_v52, %v228_v51 }
 0x106   :  { %v224_v37 = vadd.f32 %v223_v36, %v1097_v27  ;;  %v231_v41 = vadd.f32 %v230_v38, %v220_v33 }
 0x107   :  { %844 = vmatpush3.bf16.msra.mxu0 %v994_v3 }
 0x108   :  { %v225_v39 = vmul.f32 0.1, %v224_v37  ;;  %845 = vmatprep.subr.bf16.mxu0 %v931_v0 }
 0x10a   :  { %v226_v40 = vadd.f32 %v225_v39, %v173_v34 }
 0x10b   :  { %846 = vmatpush3.bf16.msra.mxu0 %v1003_v4 }
 0x10c   :  { %v232_v42 = vsub.f32 %v226_v40, %v231_v41  ;;  %847 = vmatprep.subr.bf16.mxu0 %v931_v0 }
 0x10e   :  { %vm233_vm4 = vcmp.gt.f32.partialorder %v232_v42, 0.0 }
 0x10f   :  { %v657_v43 = vsel %vm233_vm4, 1.0, %v931_v0  ;;  %vm664_vm5 = vmpackc.low %vm233_vm4, %vm233_vm4  ;;  %848 = vmatpush3.bf16.msra.mxu0 %v1012_v5 }
 0x110   :  { %v236_v44 = vsub.f32 1.0, %v657_v43  ;;  %v285_v45 = vmul.f32 0.0025714287, %v657_v43  ;;  %661 = vst [vmem:[%s1237_s2 + $0x10] sm:$0xff] %v657_v43  ;;  %836 = vmatmul.mubr.msk.bf16.vlgmr.msra.gmra.mrb[4].mxu1 %vm664_vm5, %v934_v10  ;;  %849 = vmatprep.subr.bf16.mxu0 %v931_v0  ;;  %v238_v47 = vmul.f32 0.0, %v657_v43 }
 0x111   :  { %860 = vmatpush3.bf16.msra.mxu1 %v974_v1  ;;  %875 = vmatprep.mubr.msk.bf16.mxu1 %vm932_vm0, %v931_v0 }
 0x112   :  { %v237_v46 = vmul.f32 %v236_v44, %v226_v40  ;;  %861 = vmatprep.subr.bf16.mxu1 %v931_v0  ;;  %v286_v48 = vadd.f32 %v285_v45, %v231_v41 }
 0x113   :  { %850 = vmatpush3.bf16.msra.mxu0 %v1025_v6 }
 0x114   :  { %v239_v49 = vadd.f32 %v238_v47, %v237_v46  ;;  %851 = vmatprep.subr.bf16.mxu0 %v931_v0  ;;  %v295_v54 = vsub.f32 1.0, %v286_v48 }
 0x115   :  { %862 = vmatpush3.bf16.msra.mxu1 %v985_v2 }
 0x116   :  { %863 = vmatprep.subr.bf16.mxu1 %v931_v0  ;;  %v289_v57 = vsub.f32 0.0, %v239_v49  ;;  %v296_v62 = vmul.f32 1.4285714e-06, %v295_v54 }
 0x117   :  { %852 = vmatpush3.bf16.msra.mxu0 %v1034_v7 }
 0x118   :  { %853 = vmatprep.subr.bf16.mxu0 %v931_v0  ;;  %v297_v11 = vadd.f32 %v296_v62, %v286_v48 }
 0x119   :  { %864 = vmatpush3.bf16.msra.mxu1 %v994_v3 }
 0x11a   :  { %865 = vmatprep.subr.bf16.mxu1 %v931_v0 }
 0x11b   :  { %854 = vmatpush3.bf16.msra.mxu0 %v1043_v8 }
 0x11c   :  { %879 = vmatprep.subr.bf16.mxu0 %v931_v0 }
 0x11d   :  { %866 = vmatpush3.bf16.msra.mxu1 %v1003_v4 }
 0x11e   :  { %867 = vmatprep.subr.bf16.mxu1 %v931_v0 }
 0x121   :  { %868 = vmatpush3.bf16.msra.mxu1 %v1012_v5 }
 0x122   :  { %869 = vmatprep.subr.bf16.mxu1 %v931_v0 }
 0x125   :  { %870 = vmatpush3.bf16.msra.mxu1 %v1025_v6 }
 0x126   :  { %871 = vmatprep.subr.bf16.mxu1 %v931_v0 }
 0x129   :  { %872 = vmatpush3.bf16.msra.mxu1 %v1034_v7 }
 0x12a   :  { %873 = vmatprep.subr.bf16.mxu1 %v931_v0 }
 0x12d   :  { %874 = vmatpush3.bf16.msra.mxu1 %v1043_v8 }
 0x12e   :  { %899 = vmatprep.subr.bf16.mxu1 %v931_v0 }
 0x1d1   :  { %v278_v55 = vpop.f32.mrb[4].mxu0 }
 0x1d2   :  { %v284_v56 = vadd.f32 %v278_v55, %v242_v53  ;;  %v817_v58 = vpop.f32.mrb[5].mxu0 }
 0x1d3   :  { %v281_v59 = vpop.f32.mrb[6].mxu0  ;;  %v673_v58 = vld [vmem:[%s1238_s0 + $0x28] sm:$0xff] }
 0x1d4   :  { %v290_v60 = vadd.f32 %v289_v57, %v284_v56  ;;  %v818_v61 = vpop.f32.mrb[7].mxu0  ;;  %v293_v12 = vmul.f32 -0.2, %v284_v56 }
 0x1d6   :  { %v291_v63 = vmul.f32 0.1, %v290_v60  ;;  %v294_v17 = vadd.f32 %v293_v12, %v284_v56 }
 0x1d8   :  { %v292_v9 = vadd.f32 %v291_v63, %v239_v49  ;;  %v308_v23 = vadd.f32 %v663_v18, %v294_v17 }
 0x1da   :  { %v298_v13 = vsub.f32 %v292_v9, %v297_v11 }
 0x1dc   :  { %vm299_vm6 = vcmp.gt.f32.partialorder %v298_v13, 0.0 }
 0x1dd   :  { %v662_v14 = vsel %vm299_vm6, 1.0, %v931_v0  ;;  %vm669_vm7 = vmpackc.low %vm299_vm6, %vm299_vm6 }
 0x1de   :  { %v302_v15 = vsub.f32 1.0, %v662_v14  ;;  %v351_v16 = vmul.f32 0.0025714287, %v662_v14  ;;  %666 = vst [vmem:[%s1237_s2 + $0x18] sm:$0xff] %v662_v14  ;;  %856 = vmatmul.mubr.msk.bf16.vlgmr.msra.gmra.mrb[8].mxu0 %vm669_vm7, %v934_v10  ;;  %v304_v20 = vmul.f32 0.0, %v662_v14 }
 0x1df   :  { %880 = vmatpush3.bf16.msra.mxu0 %v974_v1  ;;  %895 = vmatprep.mubr.msk.bf16.mxu0 %vm932_vm0, %v931_v0 }
 0x1e0   :  { %v303_v19 = vmul.f32 %v302_v15, %v292_v9  ;;  %v352_v21 = vadd.f32 %v351_v16, %v297_v11  ;;  %881 = vmatprep.subr.bf16.mxu0 %v931_v0 }
 0x1e2   :  { %v305_v22 = vadd.f32 %v304_v20, %v303_v19  ;;  %v361_v24 = vsub.f32 1.0, %v352_v21 }
 0x1e3   :  { %v344_v25 = vpop.f32.mrb[4].mxu1  ;;  %882 = vmatpush3.bf16.msra.mxu0 %v985_v2 }
 0x1e4   :  { %v350_v26 = vadd.f32 %v344_v25, %v308_v23  ;;  %v355_v27 = vsub.f32 0.0, %v305_v22  ;;  %v837_v28 = vpop.f32.mrb[5].mxu1  ;;  %883 = vmatprep.subr.bf16.mxu0 %v931_v0  ;;  %v362_v32 = vmul.f32 1.4285714e-06, %v361_v24 }
 0x1e5   :  { %v347_v29 = vpop.f32.mrb[6].mxu1 }
 0x1e6   :  { %v356_v30 = vadd.f32 %v355_v27, %v350_v26  ;;  %v838_v31 = vpop.f32.mrb[7].mxu1  ;;  %v363_v35 = vadd.f32 %v362_v32, %v352_v21  ;;  %v678_v32 = vld [vmem:[%s1238_s0 + $0x30] sm:$0xff] }
 0x1e7   :  { %884 = vmatpush3.bf16.msra.mxu0 %v994_v3 }
 0x1e8   :  { %v357_v33 = vmul.f32 0.1, %v356_v30  ;;  %885 = vmatprep.subr.bf16.mxu0 %v931_v0 }
 0x1ea   :  { %v358_v34 = vadd.f32 %v357_v33, %v305_v22 }
 0x1eb   :  { %886 = vmatpush3.bf16.msra.mxu0 %v1003_v4 }
 0x1ec   :  { %v364_v36 = vsub.f32 %v358_v34, %v363_v35  ;;  %887 = vmatprep.subr.bf16.mxu0 %v931_v0 }
 0x1ee   :  { %vm365_vm8 = vcmp.gt.f32.partialorder %v364_v36, 0.0 }
 0x1ef   :  { %v667_v37 = vsel %vm365_vm8, 1.0, %v931_v0  ;;  %vm674_vm9 = vmpackc.low %vm365_vm8, %vm365_vm8  ;;  %888 = vmatpush3.bf16.msra.mxu0 %v1012_v5 }
 0x1f0   :  { %v368_v38 = vsub.f32 1.0, %v667_v37  ;;  %v417_v39 = vmul.f32 0.0025714287, %v667_v37  ;;  %671 = vst [vmem:[%s1237_s2 + $0x20] sm:$0xff] %v667_v37  ;;  %876 = vmatmul.mubr.msk.bf16.vlgmr.msra.gmra.mrb[8].mxu1 %vm674_vm9, %v934_v10  ;;  %889 = vmatprep.subr.bf16.mxu0 %v931_v0  ;;  %v370_v41 = vmul.f32 0.0, %v667_v37 }
 0x1f1   :  { %900 = vmatpush3.bf16.msra.mxu1 %v974_v1  ;;  %915 = vmatprep.mubr.msk.bf16.mxu1 %vm932_vm0, %v931_v0  ;;  %v359_v1 = vmul.f32 -0.2, %v350_v26 }
 0x1f2   :  { %v369_v40 = vmul.f32 %v368_v38, %v358_v34  ;;  %901 = vmatprep.subr.bf16.mxu1 %v931_v0  ;;  %v418_v42 = vadd.f32 %v417_v39, %v363_v35 }
 0x1f3   :  { %890 = vmatpush3.bf16.msra.mxu0 %v1025_v6 }
 0x1f4   :  { %v371_v43 = vadd.f32 %v370_v41, %v369_v40  ;;  %891 = vmatprep.subr.bf16.mxu0 %v931_v0 }
 0x1f5   :  { %902 = vmatpush3.bf16.msra.mxu1 %v985_v2  ;;  %v360_v2 = vadd.f32 %v359_v1, %v350_v26 }
 0x1f6   :  { %903 = vmatprep.subr.bf16.mxu1 %v931_v0  ;;  %v421_v46 = vsub.f32 0.0, %v371_v43 }
 0x1f7   :  { %892 = vmatpush3.bf16.msra.mxu0 %v1034_v7 }
 0x1f8   :  { %893 = vmatprep.subr.bf16.mxu0 %v931_v0 }
 0x1f9   :  { %904 = vmatpush3.bf16.msra.mxu1 %v994_v3  ;;  %v668_v3 = vld [vmem:[%s1238_s0 + $0x20] sm:$0xff] }
 0x1fa   :  { %905 = vmatprep.subr.bf16.mxu1 %v931_v0 }
 0x1fb   :  { %894 = vmatpush3.bf16.msra.mxu0 %v1043_v8 }
 0x1fd   :  { %906 = vmatpush3.bf16.msra.mxu1 %v1003_v4  ;;  %v374_v4 = vadd.f32 %v668_v3, %v360_v2 }
 0x1fe   :  { %907 = vmatprep.subr.bf16.mxu1 %v931_v0 }
 0x201   :  { %908 = vmatpush3.bf16.msra.mxu1 %v1012_v5  ;;  %v427_v5 = vsub.f32 1.0, %v418_v42 }
 0x202   :  { %909 = vmatprep.subr.bf16.mxu1 %v931_v0 }
 0x205   :  { %910 = vmatpush3.bf16.msra.mxu1 %v1025_v6 }
 0x206   :  { %911 = vmatprep.subr.bf16.mxu1 %v931_v0 }
 0x209   :  { %912 = vmatpush3.bf16.msra.mxu1 %v1034_v7  ;;  %v428_v7 = vmul.f32 1.4285714e-06, %v427_v5 }
 0x20a   :  { %913 = vmatprep.subr.bf16.mxu1 %v931_v0 }
 0x20b   :  { %v429_v52 = vadd.f32 %v428_v7, %v418_v42 }
 0x20d   :  { %914 = vmatpush3.bf16.msra.mxu1 %v1043_v8 }
 0x2b1   :  { %v410_v44 = vpop.f32.mrb[8].mxu0 }
 0x2b2   :  { %v416_v45 = vadd.f32 %v410_v44, %v374_v4  ;;  %v857_v6 = vpop.f32.mrb[9].mxu0 }
 0x2b3   :  { %v413_v47 = vpop.f32.mrb[10].mxu0 }
 0x2b4   :  { %v422_v48 = vadd.f32 %v421_v46, %v416_v45  ;;  %v858_v49 = vpop.f32.mrb[11].mxu0  ;;  %v425_v8 = vmul.f32 -0.2, %v416_v45  ;;  %v683_v46 = vld [vmem:[%s1238_s0 + $0x38] sm:$0xff] }
 0x2b6   :  { %v423_v50 = vmul.f32 0.1, %v422_v48  ;;  %v426_v57 = vadd.f32 %v425_v8, %v416_v45 }
 0x2b8   :  { %v424_v51 = vadd.f32 %v423_v50, %v371_v43  ;;  %v440_v63 = vadd.f32 %v673_v58, %v426_v57 }
 0x2ba   :  { %v430_v53 = vsub.f32 %v424_v51, %v429_v52 }
 0x2bc   :  { %vm431_vm10 = vcmp.gt.f32.partialorder %v430_v53, 0.0 }
 0x2bd   :  { %v672_v54 = vsel %vm431_vm10, 1.0, %v931_v0  ;;  %vm679_vm11 = vmpackc.low %vm431_vm10, %vm431_vm10 }
 0x2be   :  { %v434_v55 = vsub.f32 1.0, %v672_v54  ;;  %v483_v56 = vmul.f32 0.0025714287, %v672_v54  ;;  %676 = vst [vmem:[%s1237_s2 + $0x28] sm:$0xff] %v672_v54  ;;  %896 = vmatmul.mubr.msk.bf16.vlgmr.msra.gmra.mrb[12].mxu0 %vm679_vm11, %v934_v10  ;;  %v436_v60 = vmul.f32 0.0, %v672_v54 }
 0x2c0   :  { %v435_v59 = vmul.f32 %v434_v55, %v424_v51  ;;  %v484_v61 = vadd.f32 %v483_v56, %v429_v52 }
 0x2c2   :  { %v437_v62 = vadd.f32 %v436_v60, %v435_v59  ;;  %v493_v9 = vsub.f32 1.0, %v484_v61 }
 0x2c3   :  { %v476_v11 = vpop.f32.mrb[8].mxu1 }
 0x2c4   :  { %v482_v12 = vadd.f32 %v476_v11, %v440_v63  ;;  %v487_v13 = vsub.f32 0.0, %v437_v62  ;;  %v877_v14 = vpop.f32.mrb[9].mxu1  ;;  %v494_v18 = vmul.f32 1.4285714e-06, %v493_v9 }
 0x2c5   :  { %v479_v15 = vpop.f32.mrb[10].mxu1 }
 0x2c6   :  { %v488_v16 = vadd.f32 %v487_v13, %v482_v12  ;;  %v878_v17 = vpop.f32.mrb[11].mxu1  ;;  %v495_v21 = vadd.f32 %v494_v18, %v484_v61  ;;  %v491_v30 = vmul.f32 -0.2, %v482_v12 }
 0x2c8   :  { %v489_v19 = vmul.f32 0.1, %v488_v16  ;;  %v492_v31 = vadd.f32 %v491_v30, %v482_v12 }
 0x2ca   :  { %v490_v20 = vadd.f32 %v489_v19, %v437_v62  ;;  %v506_v34 = vadd.f32 %v678_v32, %v492_v31 }
 0x2cc   :  { %v496_v22 = vsub.f32 %v490_v20, %v495_v21 }
 0x2ce   :  { %vm497_vm12 = vcmp.gt.f32.partialorder %v496_v22, 0.0 }
 0x2cf   :  { %v677_v23 = vsel %vm497_vm12, 1.0, %v931_v0  ;;  %vm684_vm13 = vmpackc.low %vm497_vm12, %vm497_vm12 }
 0x2d0   :  { %v500_v24 = vsub.f32 1.0, %v677_v23  ;;  %v549_v25 = vmul.f32 0.0025714287, %v677_v23  ;;  %681 = vst [vmem:[%s1237_s2 + $0x30] sm:$0xff] %v677_v23  ;;  %916 = vmatmul.mubr.msk.bf16.vlgmr.msra.gmra.mrb[12].mxu1 %vm684_vm13, %v934_v10  ;;  %v502_v28 = vmul.f32 0.0, %v677_v23 }
 0x2d2   :  { %v550_v26 = vadd.f32 %v549_v25, %v495_v21  ;;  %v501_v27 = vmul.f32 %v500_v24, %v490_v20 }
 0x2d4   :  { %v503_v29 = vadd.f32 %v502_v28, %v501_v27  ;;  %v559_v33 = vsub.f32 1.0, %v550_v26 }
 0x2d6   :  { %v553_v37 = vsub.f32 0.0, %v503_v29  ;;  %v560_v41 = vmul.f32 1.4285714e-06, %v559_v33 }
 0x2d8   :  { %v561_v1 = vadd.f32 %v560_v41, %v550_v26 }
 0x391   :  { %v542_v35 = vpop.f32.mrb[12].mxu0 }
 0x392   :  { %v548_v36 = vadd.f32 %v542_v35, %v506_v34  ;;  %v897_v38 = vpop.f32.mrb[13].mxu0 }
 0x393   :  { %v545_v39 = vpop.f32.mrb[14].mxu0 }
 0x394   :  { %v554_v40 = vadd.f32 %v553_v37, %v548_v36  ;;  %v898_v10 = vpop.f32.mrb[15].mxu0  ;;  %v557_v2 = vmul.f32 -0.2, %v548_v36 }
 0x396   :  { %v555_v42 = vmul.f32 0.1, %v554_v40  ;;  %v558_v45 = vadd.f32 %v557_v2, %v548_v36 }
 0x398   :  { %v556_v43 = vadd.f32 %v555_v42, %v503_v29 }
 0x39a   :  { %v562_v3 = vsub.f32 %v556_v43, %v561_v1 }
 0x39c   :  { %vm563_vm14 = vcmp.gt.f32.partialorder %v562_v3, 0.0 }
 0x39d   :  { %v682_v4 = vsel %vm563_vm14, 1.0, %v931_v0  ;;  %v572_v0 = vadd.f32 %v683_v46, %v558_v45 }
 0x39e   :  { %v566_v5 = vsub.f32 1.0, %v682_v4  ;;  %v615_v44 = vmul.f32 0.0025714287, %v682_v4  ;;  %686 = vst [vmem:[%s1237_s2 + $0x38] sm:$0xff] %v682_v4  ;;  %619 = vst [vmem:[%s1239_s3] sm:$0xff] %v682_v4  ;;  %v568_v47 = vmul.f32 0.0, %v682_v4 }
 0x3a0   :  { %v567_v6 = vmul.f32 %v566_v5, %v556_v43  ;;  %v616_v48 = vadd.f32 %v615_v44, %v561_v1 }
 0x3a2   :  { %v569_v49 = vadd.f32 %v568_v47, %v567_v6  ;;  %622 = vst [vmem:[%s1240_s6] sm:$0xff] %v616_v48 }
 0x3a3   :  { %v608_v7 = vpop.f32.mrb[12].mxu1 }
 0x3a4   :  { %620 = vst [vmem:[%s1241_s4] sm:$0xff] %v569_v49  ;;  %v614_v50 = vadd.f32 %v608_v7, %v572_v0  ;;  %v917_v51 = vpop.f32.mrb[13].mxu1 }
 0x3a5   :  { %v611_v52 = vpop.f32.mrb[14].mxu1 }
 0x3a6   :  { %621 = vst [vmem:[%s1242_s5] sm:$0xff] %v614_v50  ;;  %v918_v8 = vpop.f32.mrb[15].mxu1 }

</bundles_post_ra>
